<compile_context>
chip_gen: v5e
topology: v5e:2x2
jax: 0.10.0
libtpu: 0.0.40
codegen_flags: <defaults>
</compile_context>

<pallas_src>
import functools

import jax
import jax.numpy as jnp
from jax import lax
from jax.experimental import pallas as pl
from jax.experimental.pallas import tpu as pltpu


def attention_kernel(x_ref, gamma_ref, beta_ref, wq_ref, wk_ref, wv_ref,
                     wout_ref, bout_ref, o_ref, *,
                     batch_tile, seq_len, heads, dim_head, scale, eps):
    """One batch tile (batch_tile whole batch elements) per grid step.

    x_ref / o_ref blocks are (batch_tile * seq_len, D): batch is folded into the
    matmul M dimension so the projection matmuls are fed Bt*N rows.
    """
    f32 = jnp.float32
    bf16 = jnp.bfloat16

    x = x_ref[...]                               # (Bt*N, D) f32
    gamma = gamma_ref[0][None, :]                # (1, D)
    beta = beta_ref[0][None, :]
    bias = bout_ref[0][None, :]

    # --- LayerNorm over last dim (f32 stats; eps matches torch default 1e-5) ---
    mean = jnp.mean(x, axis=-1, keepdims=True)
    xc = x - mean
    var = jnp.mean(xc * xc, axis=-1, keepdims=True)
    x_ln = xc * lax.rsqrt(var + eps) * gamma + beta

    # --- QKV projections: bf16 MXU operands, f32 accumulation ---
    x_bf = x_ln.astype(bf16)
    q = jnp.dot(x_bf, wq_ref[...], preferred_element_type=f32)   # (Bt*N, inner)
    k = jnp.dot(x_bf, wk_ref[...], preferred_element_type=f32)
    v = jnp.dot(x_bf, wv_ref[...], preferred_element_type=f32)

    # Fold the softmax scale into q once (cheaper than scaling every (N, N) score).
    q = q * scale

    q_bf = q.astype(bf16)
    k_bf = k.astype(bf16)
    v_bf = v.astype(bf16)
    w_out = wout_ref[...]                        # (inner, D) bf16 (loaded once)

    d_model = w_out.shape[1]
    dn = (((1,), (1,)), ((), ()))                # contract last axes, no batch dims

    # Per-(batch, head) attention. The output projection is accumulated per head
    # so the (N, dh) head outputs are never concatenated along the lane axis.
    # NOTE: at real ViT sequence lengths (N >~ 1024) tile the KV axis with an
    # online-softmax (flash) accumulator instead of materializing (N, N) scores,
    # to stay inside v7x's 64 MiB VMEM.
    for b in range(batch_tile):
        r0 = b * seq_len
        acc = jnp.zeros((seq_len, d_model), f32)
        for h in range(heads):
            lo = h * dim_head
            hi = lo + dim_head
            qh = q_bf[r0:r0 + seq_len, lo:hi]    # (N, dh)
            kh = k_bf[r0:r0 + seq_len, lo:hi]
            vh = v_bf[r0:r0 + seq_len, lo:hi]

            # s[i, j] = sum_d qh[i, d] * kh[j, d]  — no kh.T transpose.
            s = lax.dot_general(qh, kh, dn, preferred_element_type=f32)   # (N, N)
            s_max = jnp.max(s, axis=-1, keepdims=True)
            p = jnp.exp(s - s_max)
            denom = jnp.sum(p, axis=-1, keepdims=True)
            attn = (p * pl.reciprocal(denom, approx=True)).astype(bf16)
            # TODO(synk): dropout(p=0.0) / eval mode is an identity -> not emitted.

            ov = jnp.dot(attn, vh, preferred_element_type=f32)            # (N, dh)
            acc = acc + jnp.dot(ov.astype(bf16), w_out[lo:hi, :],
                                preferred_element_type=f32)               # (N, D)

        # Lane-dense (full-D) sublane-aligned store per batch element.
        o_ref[r0:r0 + seq_len, :] = (acc + bias).astype(o_ref.dtype)


def attention_forward(x, gamma, beta, w_qkv, w_out, b_out, *, heads, dim_head,
                      batch_tile=None):
    B, N, D = x.shape
    inner = heads * dim_head
    scale = dim_head ** (-0.5)

    if batch_tile is None:
        batch_tile = B                           # whole batch per step at small sizes
    assert B % batch_tile == 0, "batch_tile must divide batch"
    rows = batch_tile * N
    grid = (B // batch_tile,)

    # Layout plumbing outside the kernel: fold batch into rows, split W_qkv into
    # separate q/k/v slabs, and ship weights as bf16 (matmuls accumulate f32).
    x2 = x.reshape(B * N, D)
    w_q = w_qkv[:, 0 * inner:1 * inner].astype(jnp.bfloat16)
    w_k = w_qkv[:, 1 * inner:2 * inner].astype(jnp.bfloat16)
    w_v = w_qkv[:, 2 * inner:3 * inner].astype(jnp.bfloat16)
    w_o = w_out.astype(jnp.bfloat16)

    kernel = functools.partial(attention_kernel, batch_tile=batch_tile,
                               seq_len=N, heads=heads, dim_head=dim_head,
                               scale=scale, eps=1e-5)

    # Advisory cost estimate so XLA schedules surrounding ops/DMA sensibly.
    flops = (2 * B * N * D * 3 * inner            # QKV projections
             + 4 * B * heads * N * N * dim_head   # QK^T and attn @ V
             + 2 * B * N * inner * D)             # output projection
    transcendentals = B * heads * N * (N + 1) + B * N
    bytes_accessed = ((2 * B * N * D + gamma.size + beta.size + b_out.size) * 4
                      + (w_q.size + w_k.size + w_v.size + w_o.size) * 2)

    out2 = pl.pallas_call(
        kernel,
        out_shape=jax.ShapeDtypeStruct((B * N, D), x.dtype),
        grid_spec=pltpu.PrefetchScalarGridSpec(
            num_scalar_prefetch=0,
            grid=grid,
            in_specs=[
                pl.BlockSpec((rows, D), lambda i: (i, 0)),        # x rows (batch tile)
                # NOTE: at real ViT sizes mark the constant operands below with
                # pipeline_mode=pl.Buffered(1) (constant index_map) so they are
                # not double-buffered in VMEM.
                pl.BlockSpec((1, D), lambda i: (0, 0)),           # gamma
                pl.BlockSpec((1, D), lambda i: (0, 0)),           # beta
                pl.BlockSpec((D, inner), lambda i: (0, 0)),       # W_q (bf16)
                pl.BlockSpec((D, inner), lambda i: (0, 0)),       # W_k (bf16)
                pl.BlockSpec((D, inner), lambda i: (0, 0)),       # W_v (bf16)
                pl.BlockSpec((inner, D), lambda i: (0, 0)),       # W_out (bf16)
                pl.BlockSpec((1, D), lambda i: (0, 0)),           # b_out
            ],
            out_specs=pl.BlockSpec((rows, D), lambda i: (i, 0)),
        ),
        compiler_params=pltpu.CompilerParams(
            dimension_semantics=("parallel",),
            vmem_limit_bytes=32 * 1024 * 1024,
        ),
        cost_estimate=pl.CostEstimate(flops=int(flops),
                                      transcendentals=int(transcendentals),
                                      bytes_accessed=int(bytes_accessed)),
    )(x2, gamma, beta, w_q, w_k, w_v, w_o, b_out)

    return out2.reshape(B, N, D)


def attention_reference(x, gamma, beta, w_qkv, w_out, b_out, *, heads, dim_head):
    """Pure-JAX (f32) reference mirroring the PyTorch forward."""
    B, N, D = x.shape
    inner = heads * dim_head
    scale = dim_head ** (-0.5)
    mean = jnp.mean(x, axis=-1, keepdims=True)
    var = jnp.mean((x - mean) ** 2, axis=-1, keepdims=True)
    x_ln = (x - mean) * jax.lax.rsqrt(var + 1e-5) * gamma[0] + beta[0]
    qkv = x_ln @ w_qkv
    q, k, v = jnp.split(qkv, 3, axis=-1)

    def to_heads(t):
        return jnp.transpose(t.reshape(B, N, heads, dim_head), (0, 2, 1, 3))

    q, k, v = map(to_heads, (q, k, v))
    dots = jnp.einsum("bhnd,bhmd->bhnm", q, k) * scale
    attn = jax.nn.softmax(dots, axis=-1)
    out = jnp.einsum("bhnm,bhmd->bhnd", attn, v)
    out = jnp.transpose(out, (0, 2, 1, 3)).reshape(B, N, inner)
    return out @ w_out + b_out[0]


if __name__ == "__main__":
    # Small shapes consistent with the module's forward.
    B, N, D = 2, 8, 32          # batch, tokens, embedding dim
    heads, dim_head = 4, 16     # inner_dim = 64 != D  -> project_out path
    inner = heads * dim_head

    key = jax.random.PRNGKey(0)
    kx, kq, ko, kb = jax.random.split(key, 4)

    x = jax.random.normal(kx, (B, N, D), dtype=jnp.float32)

    # Deterministic parameter init (shapes match nn.LayerNorm / nn.Linear).
    gamma = jnp.ones((1, D), dtype=jnp.float32)        # LayerNorm weight
    beta = jnp.zeros((1, D), dtype=jnp.float32)        # LayerNorm bias
    w_qkv = jax.random.normal(kq, (D, 3 * inner), dtype=jnp.float32) * (D ** -0.5)
    w_out = jax.random.normal(ko, (inner, D), dtype=jnp.float32) * (inner ** -0.5)
    b_out = jax.random.normal(kb, (1, D), dtype=jnp.float32) * 0.02

    out = attention_forward(x, gamma, beta, w_qkv, w_out, b_out,
                            heads=heads, dim_head=dim_head)
    out = jax.block_until_ready(out)

    ref = attention_reference(x, gamma, beta, w_qkv, w_out, b_out,
                              heads=heads, dim_head=dim_head)
    assert out.shape == (B, N, D)
    # bf16 MXU operands (with f32 accumulation) + the approximate reciprocal
    # introduce ~1e-2-level drift vs. the pure-f32 reference; tolerance reflects
    # that quantization, not a logic difference.
    max_err = jnp.max(jnp.abs(out - ref))
    assert jnp.allclose(out, ref, atol=5e-2, rtol=5e-2), (
        f"mismatch vs JAX reference (max abs err {max_err})")

    print("KERNEL_OK")
</pallas_src>

<mosaic_0001>
module attributes {stable_mosaic.version = 11 : i64} {
  func.func @attention_kernel(%arg0: i32, %arg1: memref<16x32xf32, #tpu.memory_space<vmem>>, %arg2: memref<1x32xf32, #tpu.memory_space<vmem>>, %arg3: memref<1x32xf32, #tpu.memory_space<vmem>>, %arg4: memref<32x64xbf16, #tpu.memory_space<vmem>>, %arg5: memref<32x64xbf16, #tpu.memory_space<vmem>>, %arg6: memref<32x64xbf16, #tpu.memory_space<vmem>>, %arg7: memref<64x32xbf16, #tpu.memory_space<vmem>>, %arg8: memref<1x32xf32, #tpu.memory_space<vmem>>, %arg9: memref<16x32xf32, #tpu.memory_space<vmem>>) attributes {dimension_semantics = [#tpu.dimension_semantics<parallel>], iteration_bounds = array<i64: 1>, scalar_prefetch = 0 : i64, scratch_operands = 0 : i64, tpu.core_type = #tpu.core_type<tc>, window_params = [{transform_indices = @transform_0, window_bounds = array<i64: 16, 32>}, {pipeline_mode = #tpu.pipeline_mode<synchronous>, transform_indices = @transform_1, window_bounds = array<i64: 1, 32>}, {pipeline_mode = #tpu.pipeline_mode<synchronous>, transform_indices = @transform_2, window_bounds = array<i64: 1, 32>}, {pipeline_mode = #tpu.pipeline_mode<synchronous>, transform_indices = @transform_3, window_bounds = array<i64: 32, 64>}, {pipeline_mode = #tpu.pipeline_mode<synchronous>, transform_indices = @transform_4, window_bounds = array<i64: 32, 64>}, {pipeline_mode = #tpu.pipeline_mode<synchronous>, transform_indices = @transform_5, window_bounds = array<i64: 32, 64>}, {pipeline_mode = #tpu.pipeline_mode<synchronous>, transform_indices = @transform_6, window_bounds = array<i64: 64, 32>}, {pipeline_mode = #tpu.pipeline_mode<synchronous>, transform_indices = @transform_7, window_bounds = array<i64: 1, 32>}, {transform_indices = @transform_8, window_bounds = array<i64: 16, 32>}]} {
    %c0 = arith.constant 0 : index
    %c0_0 = arith.constant 0 : index
    %0 = vector.load %arg1[%c0, %c0_0] : memref<16x32xf32, #tpu.memory_space<vmem>>, vector<16x32xf32>
    %c0_1 = arith.constant 0 : index
    %c0_2 = arith.constant 0 : index
    %1 = vector.load %arg2[%c0_1, %c0_2] : memref<1x32xf32, #tpu.memory_space<vmem>>, vector<1x32xf32>
    %2 = vector.shape_cast %1 : vector<1x32xf32> to vector<32xf32>
    %3 = vector.shape_cast %2 : vector<32xf32> to vector<1x32xf32>
    %c0_3 = arith.constant 0 : index
    %c0_4 = arith.constant 0 : index
    %4 = vector.load %arg3[%c0_3, %c0_4] : memref<1x32xf32, #tpu.memory_space<vmem>>, vector<1x32xf32>
    %5 = vector.shape_cast %4 : vector<1x32xf32> to vector<32xf32>
    %6 = vector.shape_cast %5 : vector<32xf32> to vector<1x32xf32>
    %c0_5 = arith.constant 0 : index
    %c0_6 = arith.constant 0 : index
    %7 = vector.load %arg8[%c0_5, %c0_6] : memref<1x32xf32, #tpu.memory_space<vmem>>, vector<1x32xf32>
    %8 = vector.shape_cast %7 : vector<1x32xf32> to vector<32xf32>
    %9 = vector.shape_cast %8 : vector<32xf32> to vector<1x32xf32>
    %cst = arith.constant dense<0.000000e+00> : vector<16xf32>
    %10 = vector.multi_reduction <add>, %0, %cst [1] : vector<16x32xf32> to vector<16xf32>
    %11 = vector.shape_cast %10 : vector<16xf32> to vector<16x1xf32>
    %cst_7 = arith.constant 3.200000e+01 : f32
    %12 = vector.broadcast %cst_7 : f32 to vector<16x1xf32>
    %13 = arith.divf %11, %12 : vector<16x1xf32>
    %14 = vector.broadcast %13 : vector<16x1xf32> to vector<16x32xf32>
    %15 = arith.subf %0, %14 : vector<16x32xf32>
    %16 = arith.mulf %15, %15 : vector<16x32xf32>
    %cst_8 = arith.constant dense<0.000000e+00> : vector<16xf32>
    %17 = vector.multi_reduction <add>, %16, %cst_8 [1] : vector<16x32xf32> to vector<16xf32>
    %18 = vector.shape_cast %17 : vector<16xf32> to vector<16x1xf32>
    %cst_9 = arith.constant 3.200000e+01 : f32
    %19 = vector.broadcast %cst_9 : f32 to vector<16x1xf32>
    %20 = arith.divf %18, %19 : vector<16x1xf32>
    %cst_10 = arith.constant 9.99999974E-6 : f32
    %21 = vector.broadcast %cst_10 : f32 to vector<16x1xf32>
    %22 = arith.addf %20, %21 : vector<16x1xf32>
    %23 = math.rsqrt %22 : vector<16x1xf32>
    %24 = vector.broadcast %23 : vector<16x1xf32> to vector<16x32xf32>
    %25 = arith.mulf %15, %24 : vector<16x32xf32>
    %26 = vector.broadcast %3 : vector<1x32xf32> to vector<16x32xf32>
    %27 = arith.mulf %25, %26 : vector<16x32xf32>
    %28 = vector.broadcast %6 : vector<1x32xf32> to vector<16x32xf32>
    %29 = arith.addf %27, %28 : vector<16x32xf32>
    %30 = arith.truncf %29 : vector<16x32xf32> to vector<16x32xbf16>
    %c0_11 = arith.constant 0 : index
    %c0_12 = arith.constant 0 : index
    %31 = vector.load %arg4[%c0_11, %c0_12] : memref<32x64xbf16, #tpu.memory_space<vmem>>, vector<32x64xbf16>
    %cst_13 = arith.constant dense<0.000000e+00> : vector<16x64xf32>
    %32 = tpu.matmul %30, %31, %cst_13 {dimension_numbers = #tpu.dot_dimension_numbers<[1], [0], [0], [1], [0, 0, 1, 1], [], []>} : vector<16x32xbf16>, vector<32x64xbf16>, vector<16x64xf32> -> vector<16x64xf32>
    %c0_14 = arith.constant 0 : index
    %c0_15 = arith.constant 0 : index
    %33 = vector.load %arg5[%c0_14, %c0_15] : memref<32x64xbf16, #tpu.memory_space<vmem>>, vector<32x64xbf16>
    %cst_16 = arith.constant dense<0.000000e+00> : vector<16x64xf32>
    %34 = tpu.matmul %30, %33, %cst_16 {dimension_numbers = #tpu.dot_dimension_numbers<[1], [0], [0], [1], [0, 0, 1, 1], [], []>} : vector<16x32xbf16>, vector<32x64xbf16>, vector<16x64xf32> -> vector<16x64xf32>
    %c0_17 = arith.constant 0 : index
    %c0_18 = arith.constant 0 : index
    %35 = vector.load %arg6[%c0_17, %c0_18] : memref<32x64xbf16, #tpu.memory_space<vmem>>, vector<32x64xbf16>
    %cst_19 = arith.constant dense<0.000000e+00> : vector<16x64xf32>
    %36 = tpu.matmul %30, %35, %cst_19 {dimension_numbers = #tpu.dot_dimension_numbers<[1], [0], [0], [1], [0, 0, 1, 1], [], []>} : vector<16x32xbf16>, vector<32x64xbf16>, vector<16x64xf32> -> vector<16x64xf32>
    %cst_20 = arith.constant 2.500000e-01 : f32
    %37 = vector.broadcast %cst_20 : f32 to vector<16x64xf32>
    %38 = arith.mulf %32, %37 : vector<16x64xf32>
    %39 = arith.truncf %38 : vector<16x64xf32> to vector<16x64xbf16>
    %40 = arith.truncf %34 : vector<16x64xf32> to vector<16x64xbf16>
    %41 = arith.truncf %36 : vector<16x64xf32> to vector<16x64xbf16>
    %c0_21 = arith.constant 0 : index
    %c0_22 = arith.constant 0 : index
    %42 = vector.load %arg7[%c0_21, %c0_22] : memref<64x32xbf16, #tpu.memory_space<vmem>>, vector<64x32xbf16>
    %cst_23 = arith.constant 0.000000e+00 : f32
    %43 = vector.broadcast %cst_23 : f32 to vector<8x32xf32>
    %44 = vector.extract_strided_slice %39 {offsets = [0, 0], sizes = [8, 16], strides = [1, 1]} : vector<16x64xbf16> to vector<8x16xbf16>
    %45 = vector.extract_strided_slice %40 {offsets = [0, 0], sizes = [8, 16], strides = [1, 1]} : vector<16x64xbf16> to vector<8x16xbf16>
    %46 = vector.extract_strided_slice %41 {offsets = [0, 0], sizes = [8, 16], strides = [1, 1]} : vector<16x64xbf16> to vector<8x16xbf16>
    %cst_24 = arith.constant dense<0.000000e+00> : vector<8x8xf32>
    %47 = tpu.matmul %44, %45, %cst_24 {dimension_numbers = #tpu.dot_dimension_numbers<[1], [1], [0], [0], [0, 0, 1, 0], [], []>} : vector<8x16xbf16>, vector<8x16xbf16>, vector<8x8xf32> -> vector<8x8xf32>
    %cst_25 = arith.constant dense<0xFF800000> : vector<8xf32>
    %48 = vector.multi_reduction <maximumf>, %47, %cst_25 [1] : vector<8x8xf32> to vector<8xf32>
    %49 = vector.shape_cast %48 : vector<8xf32> to vector<8x1xf32>
    %50 = vector.broadcast %49 : vector<8x1xf32> to vector<8x8xf32>
    %51 = arith.subf %47, %50 : vector<8x8xf32>
    %52 = math.exp %51 : vector<8x8xf32>
    %cst_26 = arith.constant dense<0.000000e+00> : vector<8xf32>
    %53 = vector.multi_reduction <add>, %52, %cst_26 [1] : vector<8x8xf32> to vector<8xf32>
    %54 = vector.shape_cast %53 : vector<8xf32> to vector<8x1xf32>
    %55 = tpu.reciprocal %54 {approx = true} : vector<8x1xf32> -> vector<8x1xf32>
    %56 = vector.broadcast %55 : vector<8x1xf32> to vector<8x8xf32>
    %57 = arith.mulf %52, %56 : vector<8x8xf32>
    %58 = arith.truncf %57 : vector<8x8xf32> to vector<8x8xbf16>
    %cst_27 = arith.constant dense<0.000000e+00> : vector<8x16xf32>
    %59 = tpu.matmul %58, %46, %cst_27 {dimension_numbers = #tpu.dot_dimension_numbers<[1], [0], [0], [1], [0, 0, 1, 1], [], []>} : vector<8x8xbf16>, vector<8x16xbf16>, vector<8x16xf32> -> vector<8x16xf32>
    %60 = arith.truncf %59 : vector<8x16xf32> to vector<8x16xbf16>
    %61 = vector.extract_strided_slice %42 {offsets = [0, 0], sizes = [16, 32], strides = [1, 1]} : vector<64x32xbf16> to vector<16x32xbf16>
    %cst_28 = arith.constant dense<0.000000e+00> : vector<8x32xf32>
    %62 = tpu.matmul %60, %61, %cst_28 {dimension_numbers = #tpu.dot_dimension_numbers<[1], [0], [0], [1], [0, 0, 1, 1], [], []>} : vector<8x16xbf16>, vector<16x32xbf16>, vector<8x32xf32> -> vector<8x32xf32>
    %63 = arith.addf %43, %62 : vector<8x32xf32>
    %64 = vector.extract_strided_slice %39 {offsets = [0, 16], sizes = [8, 16], strides = [1, 1]} : vector<16x64xbf16> to vector<8x16xbf16>
    %65 = vector.extract_strided_slice %40 {offsets = [0, 16], sizes = [8, 16], strides = [1, 1]} : vector<16x64xbf16> to vector<8x16xbf16>
    %66 = vector.extract_strided_slice %41 {offsets = [0, 16], sizes = [8, 16], strides = [1, 1]} : vector<16x64xbf16> to vector<8x16xbf16>
    %cst_29 = arith.constant dense<0.000000e+00> : vector<8x8xf32>
    %67 = tpu.matmul %64, %65, %cst_29 {dimension_numbers = #tpu.dot_dimension_numbers<[1], [1], [0], [0], [0, 0, 1, 0], [], []>} : vector<8x16xbf16>, vector<8x16xbf16>, vector<8x8xf32> -> vector<8x8xf32>
    %cst_30 = arith.constant dense<0xFF800000> : vector<8xf32>
    %68 = vector.multi_reduction <maximumf>, %67, %cst_30 [1] : vector<8x8xf32> to vector<8xf32>
    %69 = vector.shape_cast %68 : vector<8xf32> to vector<8x1xf32>
    %70 = vector.broadcast %69 : vector<8x1xf32> to vector<8x8xf32>
    %71 = arith.subf %67, %70 : vector<8x8xf32>
    %72 = math.exp %71 : vector<8x8xf32>
    %cst_31 = arith.constant dense<0.000000e+00> : vector<8xf32>
    %73 = vector.multi_reduction <add>, %72, %cst_31 [1] : vector<8x8xf32> to vector<8xf32>
    %74 = vector.shape_cast %73 : vector<8xf32> to vector<8x1xf32>
    %75 = tpu.reciprocal %74 {approx = true} : vector<8x1xf32> -> vector<8x1xf32>
    %76 = vector.broadcast %75 : vector<8x1xf32> to vector<8x8xf32>
    %77 = arith.mulf %72, %76 : vector<8x8xf32>
    %78 = arith.truncf %77 : vector<8x8xf32> to vector<8x8xbf16>
    %cst_32 = arith.constant dense<0.000000e+00> : vector<8x16xf32>
    %79 = tpu.matmul %78, %66, %cst_32 {dimension_numbers = #tpu.dot_dimension_numbers<[1], [0], [0], [1], [0, 0, 1, 1], [], []>} : vector<8x8xbf16>, vector<8x16xbf16>, vector<8x16xf32> -> vector<8x16xf32>
    %80 = arith.truncf %79 : vector<8x16xf32> to vector<8x16xbf16>
    %81 = vector.extract_strided_slice %42 {offsets = [16, 0], sizes = [16, 32], strides = [1, 1]} : vector<64x32xbf16> to vector<16x32xbf16>
    %cst_33 = arith.constant dense<0.000000e+00> : vector<8x32xf32>
    %82 = tpu.matmul %80, %81, %cst_33 {dimension_numbers = #tpu.dot_dimension_numbers<[1], [0], [0], [1], [0, 0, 1, 1], [], []>} : vector<8x16xbf16>, vector<16x32xbf16>, vector<8x32xf32> -> vector<8x32xf32>
    %83 = arith.addf %63, %82 : vector<8x32xf32>
    %84 = vector.extract_strided_slice %39 {offsets = [0, 32], sizes = [8, 16], strides = [1, 1]} : vector<16x64xbf16> to vector<8x16xbf16>
    %85 = vector.extract_strided_slice %40 {offsets = [0, 32], sizes = [8, 16], strides = [1, 1]} : vector<16x64xbf16> to vector<8x16xbf16>
    %86 = vector.extract_strided_slice %41 {offsets = [0, 32], sizes = [8, 16], strides = [1, 1]} : vector<16x64xbf16> to vector<8x16xbf16>
    %cst_34 = arith.constant dense<0.000000e+00> : vector<8x8xf32>
    %87 = tpu.matmul %84, %85, %cst_34 {dimension_numbers = #tpu.dot_dimension_numbers<[1], [1], [0], [0], [0, 0, 1, 0], [], []>} : vector<8x16xbf16>, vector<8x16xbf16>, vector<8x8xf32> -> vector<8x8xf32>
    %cst_35 = arith.constant dense<0xFF800000> : vector<8xf32>
    %88 = vector.multi_reduction <maximumf>, %87, %cst_35 [1] : vector<8x8xf32> to vector<8xf32>
    %89 = vector.shape_cast %88 : vector<8xf32> to vector<8x1xf32>
    %90 = vector.broadcast %89 : vector<8x1xf32> to vector<8x8xf32>
    %91 = arith.subf %87, %90 : vector<8x8xf32>
    %92 = math.exp %91 : vector<8x8xf32>
    %cst_36 = arith.constant dense<0.000000e+00> : vector<8xf32>
    %93 = vector.multi_reduction <add>, %92, %cst_36 [1] : vector<8x8xf32> to vector<8xf32>
    %94 = vector.shape_cast %93 : vector<8xf32> to vector<8x1xf32>
    %95 = tpu.reciprocal %94 {approx = true} : vector<8x1xf32> -> vector<8x1xf32>
    %96 = vector.broadcast %95 : vector<8x1xf32> to vector<8x8xf32>
    %97 = arith.mulf %92, %96 : vector<8x8xf32>
    %98 = arith.truncf %97 : vector<8x8xf32> to vector<8x8xbf16>
    %cst_37 = arith.constant dense<0.000000e+00> : vector<8x16xf32>
    %99 = tpu.matmul %98, %86, %cst_37 {dimension_numbers = #tpu.dot_dimension_numbers<[1], [0], [0], [1], [0, 0, 1, 1], [], []>} : vector<8x8xbf16>, vector<8x16xbf16>, vector<8x16xf32> -> vector<8x16xf32>
    %100 = arith.truncf %99 : vector<8x16xf32> to vector<8x16xbf16>
    %101 = vector.extract_strided_slice %42 {offsets = [32, 0], sizes = [16, 32], strides = [1, 1]} : vector<64x32xbf16> to vector<16x32xbf16>
    %cst_38 = arith.constant dense<0.000000e+00> : vector<8x32xf32>
    %102 = tpu.matmul %100, %101, %cst_38 {dimension_numbers = #tpu.dot_dimension_numbers<[1], [0], [0], [1], [0, 0, 1, 1], [], []>} : vector<8x16xbf16>, vector<16x32xbf16>, vector<8x32xf32> -> vector<8x32xf32>
    %103 = arith.addf %83, %102 : vector<8x32xf32>
    %104 = vector.extract_strided_slice %39 {offsets = [0, 48], sizes = [8, 16], strides = [1, 1]} : vector<16x64xbf16> to vector<8x16xbf16>
    %105 = vector.extract_strided_slice %40 {offsets = [0, 48], sizes = [8, 16], strides = [1, 1]} : vector<16x64xbf16> to vector<8x16xbf16>
    %106 = vector.extract_strided_slice %41 {offsets = [0, 48], sizes = [8, 16], strides = [1, 1]} : vector<16x64xbf16> to vector<8x16xbf16>
    %cst_39 = arith.constant dense<0.000000e+00> : vector<8x8xf32>
    %107 = tpu.matmul %104, %105, %cst_39 {dimension_numbers = #tpu.dot_dimension_numbers<[1], [1], [0], [0], [0, 0, 1, 0], [], []>} : vector<8x16xbf16>, vector<8x16xbf16>, vector<8x8xf32> -> vector<8x8xf32>
    %cst_40 = arith.constant dense<0xFF800000> : vector<8xf32>
    %108 = vector.multi_reduction <maximumf>, %107, %cst_40 [1] : vector<8x8xf32> to vector<8xf32>
    %109 = vector.shape_cast %108 : vector<8xf32> to vector<8x1xf32>
    %110 = vector.broadcast %109 : vector<8x1xf32> to vector<8x8xf32>
    %111 = arith.subf %107, %110 : vector<8x8xf32>
    %112 = math.exp %111 : vector<8x8xf32>
    %cst_41 = arith.constant dense<0.000000e+00> : vector<8xf32>
    %113 = vector.multi_reduction <add>, %112, %cst_41 [1] : vector<8x8xf32> to vector<8xf32>
    %114 = vector.shape_cast %113 : vector<8xf32> to vector<8x1xf32>
    %115 = tpu.reciprocal %114 {approx = true} : vector<8x1xf32> -> vector<8x1xf32>
    %116 = vector.broadcast %115 : vector<8x1xf32> to vector<8x8xf32>
    %117 = arith.mulf %112, %116 : vector<8x8xf32>
    %118 = arith.truncf %117 : vector<8x8xf32> to vector<8x8xbf16>
    %cst_42 = arith.constant dense<0.000000e+00> : vector<8x16xf32>
    %119 = tpu.matmul %118, %106, %cst_42 {dimension_numbers = #tpu.dot_dimension_numbers<[1], [0], [0], [1], [0, 0, 1, 1], [], []>} : vector<8x8xbf16>, vector<8x16xbf16>, vector<8x16xf32> -> vector<8x16xf32>
    %120 = arith.truncf %119 : vector<8x16xf32> to vector<8x16xbf16>
    %121 = vector.extract_strided_slice %42 {offsets = [48, 0], sizes = [16, 32], strides = [1, 1]} : vector<64x32xbf16> to vector<16x32xbf16>
    %cst_43 = arith.constant dense<0.000000e+00> : vector<8x32xf32>
    %122 = tpu.matmul %120, %121, %cst_43 {dimension_numbers = #tpu.dot_dimension_numbers<[1], [0], [0], [1], [0, 0, 1, 1], [], []>} : vector<8x16xbf16>, vector<16x32xbf16>, vector<8x32xf32> -> vector<8x32xf32>
    %123 = arith.addf %103, %122 : vector<8x32xf32>
    %124 = vector.broadcast %9 : vector<1x32xf32> to vector<8x32xf32>
    %125 = arith.addf %123, %124 : vector<8x32xf32>
    %c0_44 = arith.constant 0 : index
    %c0_45 = arith.constant 0 : index
    %126 = vector.load %arg9[%c0_44, %c0_45] : memref<16x32xf32, #tpu.memory_space<vmem>>, vector<8x32xf32>
    tpu.vector_store %arg9[%c0_44, %c0_45], %125 {strides = array<i32>} : memref<16x32xf32, #tpu.memory_space<vmem>>, vector<8x32xf32>,
    %cst_46 = arith.constant 0.000000e+00 : f32
    %127 = vector.broadcast %cst_46 : f32 to vector<8x32xf32>
    %128 = vector.extract_strided_slice %39 {offsets = [8, 0], sizes = [8, 16], strides = [1, 1]} : vector<16x64xbf16> to vector<8x16xbf16>
    %129 = vector.extract_strided_slice %40 {offsets = [8, 0], sizes = [8, 16], strides = [1, 1]} : vector<16x64xbf16> to vector<8x16xbf16>
    %130 = vector.extract_strided_slice %41 {offsets = [8, 0], sizes = [8, 16], strides = [1, 1]} : vector<16x64xbf16> to vector<8x16xbf16>
    %cst_47 = arith.constant dense<0.000000e+00> : vector<8x8xf32>
    %131 = tpu.matmul %128, %129, %cst_47 {dimension_numbers = #tpu.dot_dimension_numbers<[1], [1], [0], [0], [0, 0, 1, 0], [], []>} : vector<8x16xbf16>, vector<8x16xbf16>, vector<8x8xf32> -> vector<8x8xf32>
    %cst_48 = arith.constant dense<0xFF800000> : vector<8xf32>
    %132 = vector.multi_reduction <maximumf>, %131, %cst_48 [1] : vector<8x8xf32> to vector<8xf32>
    %133 = vector.shape_cast %132 : vector<8xf32> to vector<8x1xf32>
    %134 = vector.broadcast %133 : vector<8x1xf32> to vector<8x8xf32>
    %135 = arith.subf %131, %134 : vector<8x8xf32>
    %136 = math.exp %135 : vector<8x8xf32>
    %cst_49 = arith.constant dense<0.000000e+00> : vector<8xf32>
    %137 = vector.multi_reduction <add>, %136, %cst_49 [1] : vector<8x8xf32> to vector<8xf32>
    %138 = vector.shape_cast %137 : vector<8xf32> to vector<8x1xf32>
    %139 = tpu.reciprocal %138 {approx = true} : vector<8x1xf32> -> vector<8x1xf32>
    %140 = vector.broadcast %139 : vector<8x1xf32> to vector<8x8xf32>
    %141 = arith.mulf %136, %140 : vector<8x8xf32>
    %142 = arith.truncf %141 : vector<8x8xf32> to vector<8x8xbf16>
    %cst_50 = arith.constant dense<0.000000e+00> : vector<8x16xf32>
    %143 = tpu.matmul %142, %130, %cst_50 {dimension_numbers = #tpu.dot_dimension_numbers<[1], [0], [0], [1], [0, 0, 1, 1], [], []>} : vector<8x8xbf16>, vector<8x16xbf16>, vector<8x16xf32> -> vector<8x16xf32>
    %144 = arith.truncf %143 : vector<8x16xf32> to vector<8x16xbf16>
    %145 = vector.extract_strided_slice %42 {offsets = [0, 0], sizes = [16, 32], strides = [1, 1]} : vector<64x32xbf16> to vector<16x32xbf16>
    %cst_51 = arith.constant dense<0.000000e+00> : vector<8x32xf32>
    %146 = tpu.matmul %144, %145, %cst_51 {dimension_numbers = #tpu.dot_dimension_numbers<[1], [0], [0], [1], [0, 0, 1, 1], [], []>} : vector<8x16xbf16>, vector<16x32xbf16>, vector<8x32xf32> -> vector<8x32xf32>
    %147 = arith.addf %127, %146 : vector<8x32xf32>
    %148 = vector.extract_strided_slice %39 {offsets = [8, 16], sizes = [8, 16], strides = [1, 1]} : vector<16x64xbf16> to vector<8x16xbf16>
    %149 = vector.extract_strided_slice %40 {offsets = [8, 16], sizes = [8, 16], strides = [1, 1]} : vector<16x64xbf16> to vector<8x16xbf16>
    %150 = vector.extract_strided_slice %41 {offsets = [8, 16], sizes = [8, 16], strides = [1, 1]} : vector<16x64xbf16> to vector<8x16xbf16>
    %cst_52 = arith.constant dense<0.000000e+00> : vector<8x8xf32>
    %151 = tpu.matmul %148, %149, %cst_52 {dimension_numbers = #tpu.dot_dimension_numbers<[1], [1], [0], [0], [0, 0, 1, 0], [], []>} : vector<8x16xbf16>, vector<8x16xbf16>, vector<8x8xf32> -> vector<8x8xf32>
    %cst_53 = arith.constant dense<0xFF800000> : vector<8xf32>
    %152 = vector.multi_reduction <maximumf>, %151, %cst_53 [1] : vector<8x8xf32> to vector<8xf32>
    %153 = vector.shape_cast %152 : vector<8xf32> to vector<8x1xf32>
    %154 = vector.broadcast %153 : vector<8x1xf32> to vector<8x8xf32>
    %155 = arith.subf %151, %154 : vector<8x8xf32>
    %156 = math.exp %155 : vector<8x8xf32>
    %cst_54 = arith.constant dense<0.000000e+00> : vector<8xf32>
    %157 = vector.multi_reduction <add>, %156, %cst_54 [1] : vector<8x8xf32> to vector<8xf32>
    %158 = vector.shape_cast %157 : vector<8xf32> to vector<8x1xf32>
    %159 = tpu.reciprocal %158 {approx = true} : vector<8x1xf32> -> vector<8x1xf32>
    %160 = vector.broadcast %159 : vector<8x1xf32> to vector<8x8xf32>
    %161 = arith.mulf %156, %160 : vector<8x8xf32>
    %162 = arith.truncf %161 : vector<8x8xf32> to vector<8x8xbf16>
    %cst_55 = arith.constant dense<0.000000e+00> : vector<8x16xf32>
    %163 = tpu.matmul %162, %150, %cst_55 {dimension_numbers = #tpu.dot_dimension_numbers<[1], [0], [0], [1], [0, 0, 1, 1], [], []>} : vector<8x8xbf16>, vector<8x16xbf16>, vector<8x16xf32> -> vector<8x16xf32>
    %164 = arith.truncf %163 : vector<8x16xf32> to vector<8x16xbf16>
    %165 = vector.extract_strided_slice %42 {offsets = [16, 0], sizes = [16, 32], strides = [1, 1]} : vector<64x32xbf16> to vector<16x32xbf16>
    %cst_56 = arith.constant dense<0.000000e+00> : vector<8x32xf32>
    %166 = tpu.matmul %164, %165, %cst_56 {dimension_numbers = #tpu.dot_dimension_numbers<[1], [0], [0], [1], [0, 0, 1, 1], [], []>} : vector<8x16xbf16>, vector<16x32xbf16>, vector<8x32xf32> -> vector<8x32xf32>
    %167 = arith.addf %147, %166 : vector<8x32xf32>
    %168 = vector.extract_strided_slice %39 {offsets = [8, 32], sizes = [8, 16], strides = [1, 1]} : vector<16x64xbf16> to vector<8x16xbf16>
    %169 = vector.extract_strided_slice %40 {offsets = [8, 32], sizes = [8, 16], strides = [1, 1]} : vector<16x64xbf16> to vector<8x16xbf16>
    %170 = vector.extract_strided_slice %41 {offsets = [8, 32], sizes = [8, 16], strides = [1, 1]} : vector<16x64xbf16> to vector<8x16xbf16>
    %cst_57 = arith.constant dense<0.000000e+00> : vector<8x8xf32>
    %171 = tpu.matmul %168, %169, %cst_57 {dimension_numbers = #tpu.dot_dimension_numbers<[1], [1], [0], [0], [0, 0, 1, 0], [], []>} : vector<8x16xbf16>, vector<8x16xbf16>, vector<8x8xf32> -> vector<8x8xf32>
    %cst_58 = arith.constant dense<0xFF800000> : vector<8xf32>
    %172 = vector.multi_reduction <maximumf>, %171, %cst_58 [1] : vector<8x8xf32> to vector<8xf32>
    %173 = vector.shape_cast %172 : vector<8xf32> to vector<8x1xf32>
    %174 = vector.broadcast %173 : vector<8x1xf32> to vector<8x8xf32>
    %175 = arith.subf %171, %174 : vector<8x8xf32>
    %176 = math.exp %175 : vector<8x8xf32>
    %cst_59 = arith.constant dense<0.000000e+00> : vector<8xf32>
    %177 = vector.multi_reduction <add>, %176, %cst_59 [1] : vector<8x8xf32> to vector<8xf32>
    %178 = vector.shape_cast %177 : vector<8xf32> to vector<8x1xf32>
    %179 = tpu.reciprocal %178 {approx = true} : vector<8x1xf32> -> vector<8x1xf32>
    %180 = vector.broadcast %179 : vector<8x1xf32> to vector<8x8xf32>
    %181 = arith.mulf %176, %180 : vector<8x8xf32>
    %182 = arith.truncf %181 : vector<8x8xf32> to vector<8x8xbf16>
    %cst_60 = arith.constant dense<0.000000e+00> : vector<8x16xf32>
    %183 = tpu.matmul %182, %170, %cst_60 {dimension_numbers = #tpu.dot_dimension_numbers<[1], [0], [0], [1], [0, 0, 1, 1], [], []>} : vector<8x8xbf16>, vector<8x16xbf16>, vector<8x16xf32> -> vector<8x16xf32>
    %184 = arith.truncf %183 : vector<8x16xf32> to vector<8x16xbf16>
    %185 = vector.extract_strided_slice %42 {offsets = [32, 0], sizes = [16, 32], strides = [1, 1]} : vector<64x32xbf16> to vector<16x32xbf16>
    %cst_61 = arith.constant dense<0.000000e+00> : vector<8x32xf32>
    %186 = tpu.matmul %184, %185, %cst_61 {dimension_numbers = #tpu.dot_dimension_numbers<[1], [0], [0], [1], [0, 0, 1, 1], [], []>} : vector<8x16xbf16>, vector<16x32xbf16>, vector<8x32xf32> -> vector<8x32xf32>
    %187 = arith.addf %167, %186 : vector<8x32xf32>
    %188 = vector.extract_strided_slice %39 {offsets = [8, 48], sizes = [8, 16], strides = [1, 1]} : vector<16x64xbf16> to vector<8x16xbf16>
    %189 = vector.extract_strided_slice %40 {offsets = [8, 48], sizes = [8, 16], strides = [1, 1]} : vector<16x64xbf16> to vector<8x16xbf16>
    %190 = vector.extract_strided_slice %41 {offsets = [8, 48], sizes = [8, 16], strides = [1, 1]} : vector<16x64xbf16> to vector<8x16xbf16>
    %cst_62 = arith.constant dense<0.000000e+00> : vector<8x8xf32>
    %191 = tpu.matmul %188, %189, %cst_62 {dimension_numbers = #tpu.dot_dimension_numbers<[1], [1], [0], [0], [0, 0, 1, 0], [], []>} : vector<8x16xbf16>, vector<8x16xbf16>, vector<8x8xf32> -> vector<8x8xf32>
    %cst_63 = arith.constant dense<0xFF800000> : vector<8xf32>
    %192 = vector.multi_reduction <maximumf>, %191, %cst_63 [1] : vector<8x8xf32> to vector<8xf32>
    %193 = vector.shape_cast %192 : vector<8xf32> to vector<8x1xf32>
    %194 = vector.broadcast %193 : vector<8x1xf32> to vector<8x8xf32>
    %195 = arith.subf %191, %194 : vector<8x8xf32>
    %196 = math.exp %195 : vector<8x8xf32>
    %cst_64 = arith.constant dense<0.000000e+00> : vector<8xf32>
    %197 = vector.multi_reduction <add>, %196, %cst_64 [1] : vector<8x8xf32> to vector<8xf32>
    %198 = vector.shape_cast %197 : vector<8xf32> to vector<8x1xf32>
    %199 = tpu.reciprocal %198 {approx = true} : vector<8x1xf32> -> vector<8x1xf32>
    %200 = vector.broadcast %199 : vector<8x1xf32> to vector<8x8xf32>
    %201 = arith.mulf %196, %200 : vector<8x8xf32>
    %202 = arith.truncf %201 : vector<8x8xf32> to vector<8x8xbf16>
    %cst_65 = arith.constant dense<0.000000e+00> : vector<8x16xf32>
    %203 = tpu.matmul %202, %190, %cst_65 {dimension_numbers = #tpu.dot_dimension_numbers<[1], [0], [0], [1], [0, 0, 1, 1], [], []>} : vector<8x8xbf16>, vector<8x16xbf16>, vector<8x16xf32> -> vector<8x16xf32>
    %204 = arith.truncf %203 : vector<8x16xf32> to vector<8x16xbf16>
    %205 = vector.extract_strided_slice %42 {offsets = [48, 0], sizes = [16, 32], strides = [1, 1]} : vector<64x32xbf16> to vector<16x32xbf16>
    %cst_66 = arith.constant dense<0.000000e+00> : vector<8x32xf32>
    %206 = tpu.matmul %204, %205, %cst_66 {dimension_numbers = #tpu.dot_dimension_numbers<[1], [0], [0], [1], [0, 0, 1, 1], [], []>} : vector<8x16xbf16>, vector<16x32xbf16>, vector<8x32xf32> -> vector<8x32xf32>
    %207 = arith.addf %187, %206 : vector<8x32xf32>
    %208 = vector.broadcast %9 : vector<1x32xf32> to vector<8x32xf32>
    %209 = arith.addf %207, %208 : vector<8x32xf32>
    %c8 = arith.constant 8 : index
    %c0_67 = arith.constant 0 : index
    %210 = vector.load %arg9[%c8, %c0_67] : memref<16x32xf32, #tpu.memory_space<vmem>>, vector<8x32xf32>
    tpu.vector_store %arg9[%c8, %c0_67], %209 {strides = array<i32>} : memref<16x32xf32, #tpu.memory_space<vmem>>, vector<8x32xf32>,
    return
  }
  func.func @transform_0(%arg0: i32) -> (i32, i32) {
    %c0_i32 = arith.constant 0 : i32
    %c0_i32_0 = arith.constant 0 : i32
    return %arg0, %c0_i32 : i32, i32
  }
  func.func @transform_1(%arg0: i32) -> (i32, i32) {
    %c0_i32 = arith.constant 0 : i32
    %c0_i32_0 = arith.constant 0 : i32
    %c0_i32_1 = arith.constant 0 : i32
    return %c0_i32, %c0_i32_0 : i32, i32
  }
  func.func @transform_2(%arg0: i32) -> (i32, i32) {
    %c0_i32 = arith.constant 0 : i32
    %c0_i32_0 = arith.constant 0 : i32
    %c0_i32_1 = arith.constant 0 : i32
    return %c0_i32, %c0_i32_0 : i32, i32
  }
  func.func @transform_3(%arg0: i32) -> (i32, i32) {
    %c0_i32 = arith.constant 0 : i32
    %c0_i32_0 = arith.constant 0 : i32
    %c0_i32_1 = arith.constant 0 : i32
    return %c0_i32, %c0_i32_0 : i32, i32
  }
  func.func @transform_4(%arg0: i32) -> (i32, i32) {
    %c0_i32 = arith.constant 0 : i32
    %c0_i32_0 = arith.constant 0 : i32
    %c0_i32_1 = arith.constant 0 : i32
    return %c0_i32, %c0_i32_0 : i32, i32
  }
  func.func @transform_5(%arg0: i32) -> (i32, i32) {
    %c0_i32 = arith.constant 0 : i32
    %c0_i32_0 = arith.constant 0 : i32
    %c0_i32_1 = arith.constant 0 : i32
    return %c0_i32, %c0_i32_0 : i32, i32
  }
  func.func @transform_6(%arg0: i32) -> (i32, i32) {
    %c0_i32 = arith.constant 0 : i32
    %c0_i32_0 = arith.constant 0 : i32
    %c0_i32_1 = arith.constant 0 : i32
    return %c0_i32, %c0_i32_0 : i32, i32
  }
  func.func @transform_7(%arg0: i32) -> (i32, i32) {
    %c0_i32 = arith.constant 0 : i32
    %c0_i32_0 = arith.constant 0 : i32
    %c0_i32_1 = arith.constant 0 : i32
    return %c0_i32, %c0_i32_0 : i32, i32
  }
  func.func @transform_8(%arg0: i32) -> (i32, i32) {
    %c0_i32 = arith.constant 0 : i32
    %c0_i32_0 = arith.constant 0 : i32
    return %arg0, %c0_i32 : i32, i32
  }
}

</mosaic_0001>

<bundles_post_ra>
// kernel: tpu_custom_call.1
= control target key start
LH: loop header
LB: loop body
LE: loop exit
PB: predicated region body
PF: predicated region fallthrough
CT: control target
= control target key end

     0   :  { %13 = vsyncpa [#allocation3], 0  ;;  %s1316_s0 = inlined_call_operand.vmem [shape: f32[16,32], index: 0, kind: input, shape index: {}]   ;;  %s1317_s1 = inlined_call_operand.hbm [shape: f32[1,32], index: 1, kind: input, shape index: {}]   ;;  %s1318_s2 = inlined_call_operand.vmem [shape: f32[1,32], index: 2, kind: input, shape index: {}]   ;;  %s1319_s3 = inlined_call_operand.vmem [shape: bf16[32,64], index: 3, kind: input, shape index: {}]   ;;  %s1320_s4 = inlined_call_operand.vmem [shape: bf16[32,64], index: 4, kind: input, shape index: {}]   ;;  %s1321_s5 = inlined_call_operand.hbm [shape: bf16[32,64], index: 5, kind: input, shape index: {}]   ;;  %s1322_s6 = inlined_call_operand.vmem [shape: bf16[64,32], index: 6, kind: input, shape index: {}]   ;;  %s1323_s7 = inlined_call_operand.vmem [shape: f32[1,32], index: 7, kind: input, shape index: {}]   ;;  %s1324_s8 = inlined_call_operand.hbm [shape: f32[16,32], index: 8, kind: output, shape index: {}]  }
   0x1   :  { %14 = vsyncpa [#allocation6], 0 }
   0x2   :  { %15 = vsyncpa [#allocation4], 0  ;;  %s23_s29 = sshll.u32 %s1317_s1, 4  ;;  %s1093_s30 = smov [#allocation2]   ;;  %s24_s29 = int_to_ptr.hbm [resolvable:$true] %s23_s29 }
   0x3   :  { %s25_s9 = sshll.u32 %s1093_s30, 4  ;;  %s39_s12 = sshll.u32 %s1321_s5, 4  ;;  %s26_s9 = int_to_ptr.vmem [resolvable:$true] %s25_s9  ;;  %s40_s12 = int_to_ptr.hbm [resolvable:$true] %s39_s12 }
   0x4   :  { %28 = dma.hbm_to_vmem [thread:$0]  %s24_s29, 16, %s26_s9, [#allocation3]  }
   0x5   :  { %s1094_s13 = smov [#allocation5]   ;;  %s1095_s15 = smov 64  }
   0x6   :  { %s41_s14 = sshll.u32 %s1094_s13, 4  ;;  %s1096_s16 = smov 4   ;;  %s42_s14 = int_to_ptr.vmem [resolvable:$true] %s41_s14 }
   0x7   :  { %47 = dma.hbm_to_vmem [thread:$0]  %s40_s12, 256, %s42_s14, [#allocation6], %s1095_s15, %s1095_s15, %s1096_s16  }
   0x8   :  { %1087 = dma.done.wait [#allocation3], 16  }
   0x9   :  { %1088 = vsyncadd [#allocation3], 4294967280 }
   0xa   :  { %1089 = dma.done.wait [#allocation6], 256  }
   0xb   :  { %1090 = vsyncadd [#allocation6], 4294967040  ;;  %vm66_vm0 = vcmask 261120   ;;  %v61_v0 = vld [vmem:[%s1316_s0] sm:$0xff]  ;;  %v62_v2 = vld [vmem:[%s1316_s0 + $0x8] sm:$0xff]  ;;  %v1097_v4 = vmov 32.0  }
   0xc   :  { %v67_v1 = vsel %vm66_vm0, %v61_v0, 0.0  ;;  %v70_v3 = vsel %vm66_vm0, %v62_v2, 0.0  ;;  %977 = vrcp.f32 %v1097_v4  ;;  %v954_v21 = vld [vmem:[%s1319_s3 + $0x8] sm:$0xff]  ;;  %v953_v25 = vld [vmem:[%s1319_s3] sm:$0xff]  ;;  %vm238_vm8 = vcmask 130048   ;;  %s1099_s26 = smov 112  }
   0xd   :  { %68 = vadd.xlane.f32.xlu0 %v67_v1  ;;  %v956_v22 = vld [vmem:[%s1320_s4 + $0x8] sm:$0xff]  ;;  %154 = vmatpush.bf16.msra.mxu0 %v954_v21  ;;  %v955_v26 = vld [vmem:[%s1320_s4] sm:$0xff]  ;;  %vm274_vm9 = vcmask 1043456   ;;  %vm258_vm10 = vcmask 64512   ;;  %s1100_s27 = smov 80   ;;  %s872_s17 = sshll.u32 %s1324_s8, 4  ;;  %s873_s17 = int_to_ptr.hbm [resolvable:$true] %s872_s17 }
   0xe   :  { %v958_v23 = vld [vmem:[#allocation5 + $0x8] sm:$0xff]  ;;  %184 = vmatpush.bf16.msra.mxu1 %v956_v22  ;;  %v957_v28 = vld [vmem:[#allocation5] sm:$0xff]  ;;  %v974_v46 = vld [vmem:[#allocation2] ss:$0 sm:$0xff]  ;;  %s1102_s5 = smov 128   ;;  %s1103_s18 = smov 8  }
   0xf   :  { %214 = vmatpush.bf16.msra.mxu2 %v958_v23  ;;  %v975_v51 = vld [vmem:[%s1318_s2] ss:$0 sm:$0xff]  ;;  %s1098_s2 = smov 96  }
  0x11   :  { %155 = vmatpush.bf16.msra.mxu0 %v953_v25 }
  0x12   :  { %v978_v5 = vpop.eup %977  ;;  %185 = vmatpush.bf16.msra.mxu1 %v955_v26 }
  0x13   :  { %v74_v6 = vmul.f32 32.0, %v978_v5  ;;  %vm78_vm1 = vweird.f32 %v978_v5  ;;  %215 = vmatpush.bf16.msra.mxu2 %v957_v28 }
  0x15   :  { %71 = vadd.xlane.f32.xlu0 %v70_v3  ;;  %v75_v7 = vsub.f32 1.0, %v74_v6 }
  0x17   :  { %v76_v8 = vmul.f32 %v978_v5, %v75_v7 }
  0x19   :  { %v77_v9 = vadd.f32 %v978_v5, %v76_v8 }
  0x1b   :  { %v79_v10 = vsel %vm78_vm1, %v978_v5, %v77_v9 }
  0x80   :  { %v69_v11 = vpop.xlane.xlu0 %68 }
  0x81   :  { %v80_v12 = vmul.f32 %v79_v10, %v69_v11 }
  0x83   :  { %v82_v13 = vsub.f32 %v61_v0, %v80_v12 }
  0x85   :  { %v84_v14 = vmul.f32 %v82_v13, %v82_v13 }
  0x87   :  { %v86_v15 = vsel %vm66_vm0, %v84_v14, 0.0 }
  0x88   :  { %87 = vadd.xlane.f32.xlu1 %v86_v15  ;;  %v72_v16 = vpop.xlane.xlu0 %71 }
  0x89   :  { %v81_v17 = vmul.f32 %v79_v10, %v72_v16 }
  0x8b   :  { %v83_v18 = vsub.f32 %v62_v2, %v81_v17 }
  0x8d   :  { %v85_v19 = vmul.f32 %v83_v18, %v83_v18 }
  0x8f   :  { %v89_v20 = vsel %vm66_vm0, %v85_v19, 0.0 }
  0x90   :  { %90 = vadd.xlane.f32.xlu1 %v89_v20 }
  0xfb   :  { %v88_v24 = vpop.xlane.xlu1 %87 }
  0xfc   :  { %v92_v27 = vmul.f32 %v88_v24, %v79_v10 }
  0xfe   :  { %v94_v29 = vadd.f32 1e-05, %v92_v27 }
 0x100   :  { %979 = vrsqrt.f32 %v94_v29  ;;  %vm102_vm3 = vweird.f32 %v94_v29 }
 0x103   :  { %v91_v30 = vpop.xlane.xlu1 %90 }
 0x104   :  { %v93_v31 = vmul.f32 %v91_v30, %v79_v10 }
 0x106   :  { %v980_v32 = vpop.eup %979  ;;  %v95_v33 = vadd.f32 1e-05, %v93_v31 }
 0x107   :  { %v97_v34 = vmul.f32 %v980_v32, %v94_v29  ;;  %vm103_vm2 = vweird.f32 %v980_v32 }
 0x108   :  { %981 = vrsqrt.f32 %v95_v33  ;;  %vm104_vm4 = vmor %vm102_vm3, %vm103_vm2  ;;  %vm112_vm6 = vweird.f32 %v95_v33 }
 0x109   :  { %v98_v35 = vmul.f32 %v980_v32, %v97_v34 }
 0x10b   :  { %v99_v36 = vmul.f32 0.5, %v98_v35 }
 0x10d   :  { %v100_v37 = vsub.f32 1.5, %v99_v36 }
 0x10e   :  { %v982_v38 = vpop.eup %981 }
 0x10f   :  { %v101_v39 = vmul.f32 %v980_v32, %v100_v37  ;;  %v107_v40 = vmul.f32 %v982_v38, %v95_v33  ;;  %vm113_vm5 = vweird.f32 %v982_v38 }
 0x110   :  { %vm114_vm7 = vmor %vm112_vm6, %vm113_vm5 }
 0x111   :  { %v108_v41 = vmul.f32 %v982_v38, %v107_v40  ;;  %v105_v42 = vsel %vm104_vm4, %v980_v32, %v101_v39 }
 0x112   :  { %v116_v45 = vmul.f32 %v105_v42, %v82_v13 }
 0x113   :  { %v109_v43 = vmul.f32 0.5, %v108_v41 }
 0x114   :  { %v121_v50 = vmul.f32 %v974_v46, %v116_v45 }
 0x115   :  { %v110_v44 = vsub.f32 1.5, %v109_v43 }
 0x116   :  { %v126_v53 = vadd.f32 %v975_v51, %v121_v50 }
 0x117   :  { %v111_v47 = vmul.f32 %v982_v38, %v110_v44 }
 0x119   :  { %v115_v48 = vsel %vm114_vm7, %v982_v38, %v111_v47 }
 0x11a   :  { %v117_v49 = vmul.f32 %v115_v48, %v83_v18 }
 0x11c   :  { %v122_v52 = vmul.f32 %v974_v46, %v117_v49 }
 0x11e   :  { %v127_v54 = vadd.f32 %v975_v51, %v122_v52 }
 0x120   :  { %v128_v55 = vpack.c.bf16 %v127_v54, %v126_v53 }
 0x122   :  { %894 = vmatmul.msk.bf16.vlgmr.msra.gmra.mxu0 %vm66_vm0, %v128_v55  ;;  %903 = vmatmul.msk.bf16.vlgmr.msra.gmra.mxu1 %vm66_vm0, %v128_v55 }
 0x123   :  { %912 = vmatmul.msk.bf16.vlgmr.msra.gmra.mxu2 %vm66_vm0, %v128_v55 }
 0x19f   :  { %v157_v56 = vpop.f32.mrf.mxu0  ;;  %v187_v57 = vpop.f32.mrf.mxu1 }
 0x1a0   :  { %v222_v58 = vmul.f32 0.25, %v157_v56  ;;  %v226_v59 = vpack.c.bf16 %v187_v57, %v187_v57 }
 0x1a2   :  { %v224_v60 = vpack.c.bf16 %v222_v58, %v222_v58  ;;  %v298_v61 = vunpack.c.l.b16 %v226_v59  ;;  %v243_v62 = vsel %vm238_vm8, %v226_v59, 0 }
 0x1a3   :  { %252 = vmatpush.bf16.xpose.msra.mxu3 %v243_v62  ;;  %v961_v62 = vld [vmem:[%s1322_s6 + $0x10] sm:$0xff] }
 0x1a4   :  { %v293_v63 = vunpack.c.l.b16 %v224_v60  ;;  %v299_v0 = vpack.c.b16 %v298_v61, %v298_v61  ;;  %v960_v61 = vld [vmem:[%s1322_s6 + $0x8] sm:$0xff] }
 0x1a6   :  { %v1184_v1 = vpack.c.b16 %v293_v63, %v293_v63  ;;  %v217_v2 = vpop.f32.mrf.mxu2  ;;  %404 = vrot.lane.b32.xlu0 %v299_v0, %s1098_s2  ;;  %300 = vrot.lane.b32.xlu2 %v299_v0, %s1099_s26  ;;  %v959_v63 = vld [vmem:[%s1322_s6] sm:$0xff] }
 0x1a7   :  { %v228_v3 = vpack.c.bf16 %v217_v2, %v217_v2  ;;  %v189_v13 = vpop.f32.mrf.mxu1  ;;  %v159_v37 = vpop.f32.mrf.mxu0 }
 0x1a8   :  { %402 = vrot.lane.b32.xlu1 %v1184_v1, %s1098_s2  ;;  %v223_v38 = vmul.f32 0.25, %v159_v37  ;;  %v227_v42 = vpack.c.bf16 %v189_v13, %v189_v13 }
 0x1a9   :  { %v276_v4 = vsel %vm274_vm9, %v228_v3, 0  ;;  %v334_v17 = vunpack.c.l.b16 %v228_v3 }
 0x1aa   :  { %285 = vmatpush.bf16.msrb.mxu0 %v276_v4  ;;  %913 = vmatmul.msk.bf16.vlgmr.msra.gmra.mxu3 %vm238_vm8, %v224_v60  ;;  %v225_v39 = vpack.c.bf16 %v223_v38, %v223_v38  ;;  %v624_v43 = vunpack.c.l.b16 %v227_v42 }
 0x1ab   :  { %v335_v18 = vpack.c.b16 %v334_v17, %v334_v17  ;;  %374 = vmatpush.bf16.msrb.mxu3 %v960_v61 }
 0x1ac   :  { %v619_v40 = vunpack.c.l.b16 %v225_v39  ;;  %v1215_v44 = vpack.c.b16 %v624_v43, %v624_v43 }
 0x1ae   :  { %295 = vrot.lane.b32.xlu2 %v1184_v1, %s1099_s26  ;;  %v1211_v41 = vpack.c.b16 %v619_v40, %v619_v40  ;;  %396 = vmatpush.bf16.msra.mxu0 %v959_v63 }
 0x1af   :  { %475 = vmatpush.bf16.msra.mxu3 %v961_v62 }
 0x200   :  { %v301_v5 = vpop.permute.xlu2 %300 }
 0x201   :  { %v306_v6 = vsel %vm238_vm8, %v301_v5, 0 }
 0x202   :  { %315 = vmatpush.bf16.xpose.msrb.mxu1 %v306_v6 }
 0x208   :  { %v296_v7 = vpop.permute.xlu2 %295 }
 0x209   :  { %915 = vmatmul.msk.bf16.vlgmr.msrb.gmra.mxu1 %vm238_vm8, %v296_v7  ;;  %v571_v7 = vsel %vm238_vm8, %v227_v42, 0 }
 0x218   :  { %v405_v8 = vpop.permute.xlu0 %404 }
 0x219   :  { %v410_v9 = vsel %vm238_vm8, %v405_v8, 0 }
 0x21a   :  { %419 = vmatpush.bf16.xpose.msra.mxu1 %v410_v9  ;;  %v403_v10 = vpop.permute.xlu1 %402 }
 0x221   :  { %927 = vmatmul.msk.bf16.vlgmr.msra.gmra.mxu1 %vm238_vm8, %v403_v10 }
 0x22d   :  { %v254_v11 = vpop.f32.mrf.mxu3 }
 0x22e   :  { %v259_v31 = vsel %vm258_vm10, %v254_v11, -inf }
 0x235   :  { %v256_v12 = vpop.f32.mrf.mxu3 }
 0x286   :  { %v317_v14 = vpop.f32.mrf.mxu1 }
 0x287   :  { %v321_v15 = vsel %vm258_vm10, %v317_v14, -inf }
 0x288   :  { %322 = vmax.xlane.f32.xlu2 %v321_v15 }
 0x28e   :  { %v319_v16 = vpop.f32.mrf.mxu1 }
 0x29e   :  { %v421_v19 = vpop.f32.mrf.mxu1 }
 0x29f   :  { %v425_v20 = vsel %vm258_vm10, %v421_v19, -inf }
 0x2a0   :  { %336 = vrot.lane.b32.xlu2 %v335_v18, %s1099_s26  ;;  %426 = vmax.xlane.f32.xlu0 %v425_v20 }
 0x2a6   :  { %v423_v21 = vpop.f32.mrf.mxu1 }
 0x2a8   :  { %437 = vrot.lane.b32.xlu2 %v335_v18, %s1098_s2 }
 0x2b0   :  { %484 = vrot.lane.b32.xlu2 %v299_v0, %s1100_s27  ;;  %v219_v0 = vpop.f32.mrf.mxu2 }
 0x2fb   :  { %v323_v22 = vpop.xlane.xlu2 %322 }
 0x2fc   :  { %v324_v23 = vsub.f32 %v317_v14, %v323_v22  ;;  %v1240_v14 = vpack.c.bf16 %v219_v0, %v219_v0 }
 0x2fe   :  { %v325_v24 = vmul.f32 1.442695, %v324_v23  ;;  %v602_v17 = vsel %vm274_vm9, %v1240_v14, 0 }
 0x300   :  { %983 = vpow2.f32 %v325_v24 }
 0x303   :  { %v337_v25 = vpop.permute.xlu2 %336 }
 0x304   :  { %v342_v26 = vsel %vm274_vm9, %v337_v25, 0 }
 0x305   :  { %351 = vmatpush.bf16.msrb.mxu2 %v342_v26 }
 0x306   :  { %v984_v27 = vpop.eup %983 }
 0x307   :  { %v327_v28 = vsel %vm258_vm10, %v984_v27, 0.0 }
 0x308   :  { %328 = vadd.xlane.f32.xlu1 %v327_v28 }
 0x30b   :  { %v438_v29 = vpop.permute.xlu2 %437 }
 0x30c   :  { %v443_v30 = vsel %vm274_vm9, %v438_v29, 0 }
 0x30d   :  { %452 = vmatpush.bf16.msra.mxu2 %v443_v30 }
 0x310   :  { %260 = vmax.xlane.f32.xlu1 %v259_v31 }
 0x313   :  { %v427_v32 = vpop.xlane.xlu0 %426  ;;  %v485_v6 = vpop.permute.xlu2 %484 }
 0x314   :  { %v428_v33 = vsub.f32 %v421_v19, %v427_v32  ;;  %v490_v9 = vsel %vm238_vm8, %v485_v6, 0 }
 0x316   :  { %v429_v34 = vmul.f32 1.442695, %v428_v33 }
 0x318   :  { %985 = vpow2.f32 %v429_v34 }
 0x31e   :  { %v986_v35 = vpop.eup %985 }
 0x31f   :  { %v431_v36 = vsel %vm258_vm10, %v986_v35, 0.0 }
 0x320   :  { %432 = vadd.xlane.f32.xlu0 %v431_v36 }
 0x329   :  { %482 = vrot.lane.b32.xlu1 %v1184_v1, %s1100_s27 }
 0x331   :  { %517 = vrot.lane.b32.xlu1 %v335_v18, %s1100_s27 }
 0x339   :  { %621 = vrot.lane.b32.xlu1 %v1211_v41, %s1099_s26 }
 0x341   :  { %718 = vrot.lane.b32.xlu1 %v1215_v44, %s1098_s2 }
 0x349   :  { %790 = vrot.lane.b32.xlu1 %v1211_v41, %s1100_s27 }
 0x37b   :  { %v329_v45 = vpop.xlane.xlu1 %328 }
 0x37c   :  { %987 = vrcp.f32 %v329_v45 }
 0x382   :  { %v988_v46 = vpop.eup %987 }
 0x383   :  { %v331_v47 = vmul.f32 %v988_v46, %v984_v27  ;;  %v261_v48 = vpop.xlane.xlu1 %260 }
 0x384   :  { %v262_v49 = vsub.f32 %v254_v11, %v261_v48 }
 0x385   :  { %v332_v50 = vpack.c.bf16 %v331_v47, %v331_v47 }
 0x386   :  { %v263_v51 = vmul.f32 1.442695, %v262_v49 }
 0x387   :  { %916 = vmatmul.msk.bf16.vlgmr.msrb.gmra.mxu2 %vm258_vm10, %v332_v50 }
 0x388   :  { %989 = vpow2.f32 %v263_v51 }
 0x38e   :  { %v990_v52 = vpop.eup %989 }
 0x38f   :  { %v265_v53 = vsel %vm258_vm10, %v990_v52, 0.0 }
 0x390   :  { %266 = vadd.xlane.f32.xlu0 %v265_v53 }
 0x393   :  { %v433_v54 = vpop.xlane.xlu0 %432 }
 0x394   :  { %991 = vrcp.f32 %v433_v54 }
 0x39a   :  { %v992_v55 = vpop.eup %991 }
 0x39b   :  { %v435_v56 = vmul.f32 %v992_v55, %v986_v35  ;;  %v483_v57 = vpop.permute.xlu1 %482 }
 0x39d   :  { %v436_v58 = vpack.c.bf16 %v435_v56, %v435_v56 }
 0x39f   :  { %928 = vmatmul.msk.bf16.vlgmr.msra.gmra.mxu2 %vm258_vm10, %v436_v58 }
 0x3a3   :  { %v518_v59 = vpop.permute.xlu1 %517 }
 0x3a4   :  { %v523_v60 = vsel %vm274_vm9, %v518_v59, 0 }
 0x3a5   :  { %532 = vmatpush.bf16.msrb.mxu1 %v523_v60 }
 0x3ab   :  { %v622_v48 = vpop.permute.xlu1 %621 }
 0x3b3   :  { %v719_v51 = vpop.permute.xlu1 %718 }
 0x3b4   :  { %v724_v54 = vsel %vm238_vm8, %v719_v51, 0 }
 0x3bb   :  { %v791_v60 = vpop.permute.xlu1 %790 }
 0x403   :  { %v267_v1 = vpop.xlane.xlu0 %266 }
 0x404   :  { %993 = vrcp.f32 %v267_v1 }
 0x40a   :  { %v994_v2 = vpop.eup %993  ;;  %v353_v3 = vpop.f32.mrf.mxu2 }
 0x40b   :  { %v269_v4 = vmul.f32 %v994_v2, %v990_v52  ;;  %v357_v5 = vpack.c.bf16 %v353_v3, %v353_v3 }
 0x40d   :  { %921 = vmatmul.msk.bf16.vlgmr.msrb.gmra.mxu3 %vm238_vm8, %v357_v5  ;;  %v270_v8 = vpack.c.bf16 %v269_v4, %v269_v4 }
 0x40e   :  { %580 = vmatpush.bf16.xpose.msrb.mxu3 %v571_v7 }
 0x40f   :  { %914 = vmatmul.msk.bf16.vlgmr.msrb.gmra.mxu0 %vm258_vm10, %v270_v8 }
 0x410   :  { %499 = vmatpush.bf16.xpose.msrb.mxu0 %v490_v9 }
 0x412   :  { %v355_v10 = vpop.f32.mrf.mxu2 }
 0x422   :  { %v454_v11 = vpop.f32.mrf.mxu2 }
 0x423   :  { %v458_v12 = vpack.c.bf16 %v454_v11, %v454_v11 }
 0x425   :  { %933 = vmatmul.msk.bf16.vlgmr.msra.gmra.mxu3 %vm238_vm8, %v458_v12  ;;  %v660_v12 = vunpack.c.l.b16 %v1240_v14 }
 0x426   :  { %694 = vmatpush.bf16.msra.mxu3 %v960_v61  ;;  %v1274_v61 = vld [vmem:[%s1322_s6 + $0x18] sm:$0xff] }
 0x427   :  { %555 = vmatpush.bf16.msrb.mxu2 %v1274_v61 }
 0x42a   :  { %v456_v13 = vpop.f32.mrf.mxu2 }
 0x42b   :  { %v661_v13 = vpack.c.b16 %v660_v12, %v660_v12 }
 0x435   :  { %941 = vmatmul.msk.bf16.vlgmr.msrb.gmra.mxu3 %vm238_vm8, %v225_v39 }
 0x436   :  { %783 = vmatpush.bf16.msrb.mxu3 %v961_v62 }
 0x48c   :  { %v287_v15 = vpop.f32.mrf.mxu0 }
 0x48d   :  { %v291_v16 = vpack.c.bf16 %v287_v15, %v287_v15 }
 0x48f   :  { %926 = vmatmul.msk.bf16.vlgmr.msra.gmra.mxu0 %vm238_vm8, %v291_v16 }
 0x490   :  { %611 = vmatpush.bf16.msra.mxu0 %v602_v17  ;;  %v1245_v18 = vpop.f32.mrf.mxu3 }
 0x494   :  { %v289_v19 = vpop.f32.mrf.mxu0 }
 0x495   :  { %v1291_v19 = vld [vmem:[%s1323_s7] ss:$0 sm:$0xff]  ;;  %s1101_s7 = smov [#allocation7]  }
 0x496   :  { %s870_s15 = sshll.u32 %s1101_s7, 4  ;;  %s871_s15 = int_to_ptr.vmem [resolvable:$true] %s870_s15 }
 0x498   :  { %v378_v20 = vpop.f32.mrf.mxu3 }
 0x49f   :  { %934 = vmatmul.msk.bf16.vlgmr.msrb.gmra.mxu0 %vm238_vm8, %v483_v57 }
 0x4a0   :  { %710 = vmatpush.bf16.msrb.mxu0 %v959_v63 }
 0x4a8   :  { %v1248_v21 = vpop.f32.mrf.mxu3 }
 0x4b0   :  { %v479_v22 = vpop.f32.mrf.mxu3 }
 0x4b8   :  { %v582_v23 = vpop.f32.mrf.mxu3 }
 0x4b9   :  { %v586_v24 = vsel %vm258_vm10, %v582_v23, -inf }
 0x4ba   :  { %587 = vmax.xlane.f32.xlu0 %v586_v24 }
 0x4c0   :  { %v584_v25 = vpop.f32.mrf.mxu3 }
 0x50c   :  { %v1251_v26 = vpop.f32.mrf.mxu0 }
 0x50d   :  { %v399_v15 = vadd.f32 %v1251_v26, %v1245_v18 }
 0x50f   :  { %v481_v17 = vadd.f32 %v1248_v21, %v399_v15 }
 0x514   :  { %v400_v27 = vpop.f32.mrf.mxu0 }
 0x51c   :  { %v501_v28 = vpop.f32.mrf.mxu0 }
 0x51d   :  { %v505_v29 = vsel %vm258_vm10, %v501_v28, -inf }
 0x51e   :  { %506 = vmax.xlane.f32.xlu0 %v505_v29 }
 0x524   :  { %v503_v30 = vpop.f32.mrf.mxu0 }
 0x52d   :  { %v588_v31 = vpop.xlane.xlu0 %587 }
 0x52e   :  { %v589_v32 = vsub.f32 %v582_v23, %v588_v31 }
 0x530   :  { %v590_v33 = vmul.f32 1.442695, %v589_v32 }
 0x532   :  { %995 = vpow2.f32 %v590_v33 }
 0x538   :  { %v996_v34 = vpop.eup %995 }
 0x539   :  { %v592_v35 = vsel %vm258_vm10, %v996_v34, 0.0 }
 0x53a   :  { %593 = vadd.xlane.f32.xlu2 %v592_v35 }
 0x552   :  { %716 = vrot.lane.b32.xlu2 %v1211_v41, %s1098_s2 }
 0x591   :  { %v507_v36 = vpop.xlane.xlu0 %506 }
 0x592   :  { %v508_v37 = vsub.f32 %v501_v28, %v507_v36 }
 0x594   :  { %v509_v38 = vmul.f32 1.442695, %v508_v37 }
 0x596   :  { %997 = vpow2.f32 %v509_v38 }
 0x59c   :  { %v998_v39 = vpop.eup %997 }
 0x59d   :  { %v511_v40 = vsel %vm258_vm10, %v998_v39, 0.0 }
 0x59e   :  { %512 = vadd.xlane.f32.xlu0 %v511_v40 }
 0x5ad   :  { %v594_v42 = vpop.xlane.xlu2 %593 }
 0x5ae   :  { %999 = vrcp.f32 %v594_v42 }
 0x5b2   :  { %626 = vrot.lane.b32.xlu0 %v1215_v44, %s1099_s26 }
 0x5b4   :  { %v1000_v43 = vpop.eup %999 }
 0x5b5   :  { %v596_v45 = vmul.f32 %v1000_v43, %v996_v34  ;;  %v717_v58 = vpop.permute.xlu2 %716 }
 0x5b7   :  { %v597_v46 = vpack.c.bf16 %v596_v45, %v596_v45 }
 0x5b9   :  { %942 = vmatmul.msk.bf16.vlgmr.msra.gmra.mxu0 %vm258_vm10, %v597_v46 }
 0x5ba   :  { %792 = vrot.lane.b32.xlu0 %v1215_v44, %s1100_s27 }
 0x611   :  { %v513_v41 = vpop.xlane.xlu0 %512 }
 0x612   :  { %1001 = vrcp.f32 %v513_v41 }
 0x618   :  { %v1002_v47 = vpop.eup %1001 }
 0x619   :  { %v515_v49 = vmul.f32 %v1002_v47, %v998_v39 }
 0x61b   :  { %v516_v50 = vpack.c.bf16 %v515_v49, %v515_v49 }
 0x61d   :  { %935 = vmatmul.msk.bf16.vlgmr.msrb.gmra.mxu1 %vm258_vm10, %v516_v50 }
 0x624   :  { %v627_v52 = vpop.permute.xlu0 %626 }
 0x625   :  { %v632_v53 = vsel %vm238_vm8, %v627_v52, 0 }
 0x626   :  { %641 = vmatpush.bf16.xpose.msra.mxu1 %v632_v53 }
 0x62c   :  { %v793_v55 = vpop.permute.xlu0 %792 }
 0x62d   :  { %v798_v56 = vsel %vm238_vm8, %v793_v55, 0  ;;  %943 = vmatmul.msk.bf16.vlgmr.msra.gmra.mxu1 %vm238_vm8, %v622_v48 }
 0x62e   :  { %733 = vmatpush.bf16.xpose.msrb.mxu1 %v724_v54  ;;  %807 = vmatpush.bf16.xpose.msra.mxu0 %v798_v56 }
 0x636   :  { %v613_v44 = vpop.f32.mrf.mxu0 }
 0x637   :  { %v617_v57 = vpack.c.bf16 %v613_v44, %v613_v44 }
 0x639   :  { %946 = vmatmul.msk.bf16.vlgmr.msrb.gmra.mxu0 %vm238_vm8, %v617_v57 }
 0x63d   :  { %947 = vmatmul.msk.bf16.vlgmr.msrb.gmra.mxu1 %vm238_vm8, %v717_v58 }
 0x63e   :  { %v615_v59 = vpop.f32.mrf.mxu0 }
 0x649   :  { %950 = vmatmul.msk.bf16.vlgmr.msra.gmra.mxu0 %vm238_vm8, %v791_v60 }
 0x69a   :  { %v534_v62 = vpop.f32.mrf.mxu1 }
 0x69b   :  { %v538_v63 = vpack.c.bf16 %v534_v62, %v534_v62 }
 0x69d   :  { %940 = vmatmul.msk.bf16.vlgmr.msrb.gmra.mxu2 %vm238_vm8, %v538_v63 }
 0x6a2   :  { %v536_v0 = vpop.f32.mrf.mxu1 }
 0x6aa   :  { %v643_v1 = vpop.f32.mrf.mxu1 }
 0x6ab   :  { %v647_v2 = vsel %vm258_vm10, %v643_v1, -inf }
 0x6ac   :  { %648 = vmax.xlane.f32.xlu0 %v647_v2 }
 0x6b2   :  { %v645_v3 = vpop.f32.mrf.mxu1 }
 0x6b6   :  { %v1279_v4 = vpop.f32.mrf.mxu0 }
 0x6ba   :  { %v735_v5 = vpop.f32.mrf.mxu1 }
 0x6bb   :  { %v739_v6 = vsel %vm258_vm10, %v735_v5, -inf }
 0x6bc   :  { %740 = vmax.xlane.f32.xlu1 %v739_v6 }
 0x6be   :  { %v714_v7 = vpop.f32.mrf.mxu0 }
 0x6c2   :  { %v737_v8 = vpop.f32.mrf.mxu1 }
 0x6c6   :  { %v809_v9 = vpop.f32.mrf.mxu0 }
 0x6c7   :  { %v813_v10 = vsel %vm258_vm10, %v809_v9, -inf }
 0x6c8   :  { %814 = vmax.xlane.f32.xlu2 %v813_v10 }
 0x6ce   :  { %v811_v11 = vpop.f32.mrf.mxu0 }
 0x6d5   :  { %662 = vrot.lane.b32.xlu1 %v661_v13, %s1099_s26 }
 0x71f   :  { %v649_v16 = vpop.xlane.xlu0 %648 }
 0x720   :  { %v650_v20 = vsub.f32 %v643_v1, %v649_v16  ;;  %v557_v22 = vpop.f32.mrf.mxu2 }
 0x721   :  { %v561_v23 = vadd.f32 %v557_v22, %v481_v17 }
 0x722   :  { %v651_v24 = vmul.f32 1.442695, %v650_v20 }
 0x723   :  { %v565_v14 = vadd.f32 %v1291_v19, %v561_v23 }
 0x724   :  { %1003 = vpow2.f32 %v651_v24 }
 0x725   :  { %566 = vst.msk [vmem:[#allocation7] sm:$0xff] %vm66_vm0, %v565_v14 }
 0x728   :  { %v559_v25 = vpop.f32.mrf.mxu2 }
 0x72a   :  { %v1004_v27 = vpop.eup %1003 }
 0x72b   :  { %v653_v18 = vsel %vm258_vm10, %v1004_v27, 0.0 }
 0x72c   :  { %654 = vadd.xlane.f32.xlu0 %v653_v18 }
 0x72f   :  { %v741_v21 = vpop.xlane.xlu1 %740 }
 0x730   :  { %v742_v26 = vsub.f32 %v735_v5, %v741_v21 }
 0x732   :  { %v743_v28 = vmul.f32 1.442695, %v742_v26 }
 0x734   :  { %1005 = vpow2.f32 %v743_v28 }
 0x73a   :  { %v1006_v29 = vpop.eup %1005 }
 0x73b   :  { %v815_v30 = vpop.xlane.xlu2 %814  ;;  %v745_v31 = vsel %vm258_vm10, %v1006_v29, 0.0 }
 0x73c   :  { %v816_v32 = vsub.f32 %v809_v9, %v815_v30  ;;  %746 = vadd.xlane.f32.xlu0 %v745_v31 }
 0x73e   :  { %v817_v33 = vmul.f32 1.442695, %v816_v32 }
 0x740   :  { %1007 = vpow2.f32 %v817_v33 }
 0x746   :  { %v1008_v34 = vpop.eup %1007 }
 0x747   :  { %v663_v35 = vpop.permute.xlu1 %662  ;;  %v819_v36 = vsel %vm258_vm10, %v1008_v34, 0.0 }
 0x748   :  { %v668_v37 = vsel %vm274_vm9, %v663_v35, 0  ;;  %820 = vadd.xlane.f32.xlu2 %v819_v36 }
 0x749   :  { %677 = vmatpush.bf16.msra.mxu2 %v668_v37 }
 0x750   :  { %751 = vrot.lane.b32.xlu0 %v661_v13, %s1098_s2 }
 0x760   :  { %825 = vrot.lane.b32.xlu2 %v661_v13, %s1100_s27 }
 0x79f   :  { %v655_v38 = vpop.xlane.xlu0 %654 }
 0x7a0   :  { %1009 = vrcp.f32 %v655_v38 }
 0x7a6   :  { %v1010_v39 = vpop.eup %1009 }
 0x7a7   :  { %v657_v40 = vmul.f32 %v1010_v39, %v1004_v27 }
 0x7a9   :  { %v658_v42 = vpack.c.bf16 %v657_v40, %v657_v40 }
 0x7ab   :  { %944 = vmatmul.msk.bf16.vlgmr.msra.gmra.mxu2 %vm258_vm10, %v658_v42 }
 0x7af   :  { %v747_v43 = vpop.xlane.xlu0 %746 }
 0x7b0   :  { %1011 = vrcp.f32 %v747_v43 }
 0x7b6   :  { %v1012_v46 = vpop.eup %1011 }
 0x7b7   :  { %v749_v41 = vmul.f32 %v1012_v46, %v1006_v29 }
 0x7b9   :  { %v750_v53 = vpack.c.bf16 %v749_v41, %v749_v41 }
 0x7bb   :  { %v821_v45 = vpop.xlane.xlu2 %820 }
 0x7bc   :  { %1013 = vrcp.f32 %v821_v45 }
 0x7c2   :  { %v1014_v47 = vpop.eup %1013  ;;  %v752_v48 = vpop.permute.xlu0 %751 }
 0x7c3   :  { %v823_v49 = vmul.f32 %v1014_v47, %v1008_v34  ;;  %v757_v50 = vsel %vm274_vm9, %v752_v48, 0  ;;  %v826_v51 = vpop.permute.xlu2 %825 }
 0x7c4   :  { %v831_v52 = vsel %vm274_vm9, %v826_v51, 0  ;;  %766 = vmatpush.bf16.msrb.mxu2 %v757_v50 }
 0x7c5   :  { %v824_v54 = vpack.c.bf16 %v823_v49, %v823_v49  ;;  %840 = vmatpush.bf16.msra.mxu1 %v831_v52 }
 0x7c7   :  { %948 = vmatmul.msk.bf16.vlgmr.msrb.gmra.mxu2 %vm258_vm10, %v750_v53 }
 0x7c8   :  { %857 = vmatpush.bf16.msra.mxu2 %v1274_v61  ;;  %951 = vmatmul.msk.bf16.vlgmr.msra.gmra.mxu1 %vm258_vm10, %v824_v54 }
 0x82e   :  { %v679_v55 = vpop.f32.mrf.mxu2 }
 0x82f   :  { %v683_v56 = vpack.c.bf16 %v679_v55, %v679_v55 }
 0x831   :  { %945 = vmatmul.msk.bf16.vlgmr.msra.gmra.mxu3 %vm238_vm8, %v683_v56 }
 0x836   :  { %v681_v44 = vpop.f32.mrf.mxu2 }
 0x845   :  { %v842_v57 = vpop.f32.mrf.mxu1 }
 0x846   :  { %v846_v58 = vpack.c.bf16 %v842_v57, %v842_v57 }
 0x848   :  { %952 = vmatmul.msk.bf16.vlgmr.msra.gmra.mxu2 %vm238_vm8, %v846_v58 }
 0x84a   :  { %v768_v59 = vpop.f32.mrf.mxu2 }
 0x84b   :  { %v772_v60 = vpack.c.bf16 %v768_v59, %v768_v59 }
 0x84d   :  { %949 = vmatmul.msk.bf16.vlgmr.msrb.gmra.mxu3 %vm238_vm8, %v772_v60  ;;  %v844_v62 = vpop.f32.mrf.mxu1 }
 0x852   :  { %v770_v63 = vpop.f32.mrf.mxu2 }
 0x8b4   :  { %v696_v61 = vpop.f32.mrf.mxu3 }
 0x8b5   :  { %v713_v2 = vadd.f32 %v1279_v4, %v696_v61 }
 0x8bc   :  { %v698_v0 = vpop.f32.mrf.mxu3 }
 0x8cb   :  { %v859_v1 = vpop.f32.mrf.mxu2 }
 0x8d0   :  { %v785_v3 = vpop.f32.mrf.mxu3 }
 0x8d1   :  { %v789_v5 = vadd.f32 %v785_v3, %v713_v2 }
 0x8d3   :  { %v863_v6 = vadd.f32 %v859_v1, %v789_v5  ;;  %v861_v7 = vpop.f32.mrf.mxu2 }
 0x8d5   :  { %v864_v8 = vadd.f32 %v1291_v19, %v863_v6 }
 0x8d7   :  { %865 = vst.msk [vmem:[#allocation7 + $0x8] sm:$0xff] %vm66_vm0, %v864_v8 }
 0x8d8   :  { %v787_v9 = vpop.f32.mrf.mxu3  ;;  %878 = dma.vmem_to_hbm [thread:$0]  %s871_s15, 256, %s873_s17, [#allocation4], %s1102_s5, %s1102_s5, %s1103_s18  }
 0x8d9   :  { %1091 = dma.done.wait [#allocation4], 256  }
 0x8da   :  { %1092 = vsyncadd [#allocation4], 4294967040 }
 0x8db   :  { %883 = vsyncpa [#allocation3], 1 }
 0x8dc   :  { %884 = vsyncpa [#allocation6], 1 }
 0x8dd   :  { %885 = vsyncpa [#allocation4], 1 }

</bundles_post_ra>
